<compile_context>
chip_gen: v7x
topology: tpu7x:2x2x1
jax: 0.10.0
libtpu: 0.0.40
codegen_flags: <defaults>
</compile_context>

<pallas_src>
import functools

import jax
import jax.numpy as jnp
from jax.experimental import pallas as pl
from jax.experimental.pallas import tpu as pltpu


def weathernet_kernel(xT_ref, w1_ref, b1_ref, w2_ref, b2_ref, oT_ref):
    xT = xT_ref[...]          # [3, TB]   f32 (batch on lanes)
    w1 = w1_ref[...]          # [16, 3]   (PyTorch fc1.weight layout)
    b1 = b1_ref[...]          # [16, 1]
    w2 = w2_ref[...]          # [4, 16]   (PyTorch fc2.weight layout)
    b2 = b2_ref[...]          # [4, 1]

    # fc1: h[16, TB] = w1 @ xT + b1, computed as 3 unrolled broadcast FMAs on the
    # VPU (a K=3 contraction would waste >99% of the MXU).
    h = b1 + w1[:, 0:1] * xT[0:1, :]
    for k in range(1, 3):
        h = h + w1[:, k:k + 1] * xT[k:k + 1, :]
    h = jnp.maximum(h, 0.0)   # ReLU, [16, TB]

    # fc2: y[4, TB] = w2 @ h + b2, 16 unrolled broadcast FMAs (M=4, K=16 -> VPU).
    y = b2 + w2[:, 0:1] * h[0:1, :]
    for k in range(1, 16):
        y = y + w2[:, k:k + 1] * h[k:k + 1, :]

    oT_ref[...] = y.astype(oT_ref.dtype)   # [4, TB], lane-dense store


@functools.partial(jax.jit, static_argnames=("tb",))
def weathernet_forward(x, w1, b1, w2, b2, *, tb=2048):
    """Forward pass of WeatherNet.

    x : [B, 3] float32 (PyTorch batch-major convention)
    w1: [16, 3], b1: [16]   (exactly PyTorch fc1.weight / fc1.bias)
    w2: [4, 16], b2: [4]    (exactly PyTorch fc2.weight / fc2.bias)
    returns [B, 4] float32
    """
    assert tb % 128 == 0, "batch tile must be a multiple of the 128-lane width"
    B = x.shape[0]

    # Shrink the tile for tiny batches, then pad the batch to a tile multiple.
    tb_eff = max(128, min(tb, pl.cdiv(B, 128) * 128))
    Bp = pl.cdiv(B, tb_eff) * tb_eff
    n_tiles = Bp // tb_eff

    # Batch-last layout: xT [3, Bp].  Callers holding data batch-last can skip this.
    xT = jnp.pad(x, ((0, Bp - B), (0, 0))).T
    b1c = b1.reshape(16, 1)
    b2c = b2.reshape(4, 1)

    cost = pl.CostEstimate(
        flops=2 * Bp * (3 * 16 + 16 * 4),
        transcendentals=0,
        bytes_accessed=4 * (Bp * (3 + 4) + 16 * 3 + 16 + 4 * 16 + 4),
    )

    outT = pl.pallas_call(
        weathernet_kernel,
        out_shape=jax.ShapeDtypeStruct((4, Bp), jnp.float32),
        grid_spec=pltpu.PrefetchScalarGridSpec(
            num_scalar_prefetch=0,
            grid=(n_tiles,),
            in_specs=[
                pl.BlockSpec((3, tb_eff), lambda i: (0, i)),   # xT: streamed over batch
                pl.BlockSpec((16, 3), lambda i: (0, 0)),       # w1: VMEM-resident
                pl.BlockSpec((16, 1), lambda i: (0, 0)),       # b1: VMEM-resident
                pl.BlockSpec((4, 16), lambda i: (0, 0)),       # w2: VMEM-resident
                pl.BlockSpec((4, 1), lambda i: (0, 0)),        # b2: VMEM-resident
            ],
            out_specs=pl.BlockSpec((4, tb_eff), lambda i: (0, i)),
        ),
        compiler_params=pltpu.CompilerParams(
            dimension_semantics=("parallel",),       # shard batch tiles across TCs
            vmem_limit_bytes=64 * 1024 * 1024,
        ),
        cost_estimate=cost,
    )(xT, w1, b1c, w2, b2c)

    return outT[:, :B].T   # back to [B, 4]


def init_params(key):
    # PyTorch default Linear init: U(-1/sqrt(fan_in), 1/sqrt(fan_in)), native layout.
    k1, k2, k3, k4 = jax.random.split(key, 4)
    bound1 = 1.0 / jnp.sqrt(3.0)
    bound2 = 1.0 / jnp.sqrt(16.0)
    w1 = jax.random.uniform(k1, (16, 3), jnp.float32, -bound1, bound1)
    b1 = jax.random.uniform(k2, (16,), jnp.float32, -bound1, bound1)
    w2 = jax.random.uniform(k3, (4, 16), jnp.float32, -bound2, bound2)
    b2 = jax.random.uniform(k4, (4,), jnp.float32, -bound2, bound2)
    return w1, b1, w2, b2


def reference_forward(x, w1, b1, w2, b2):
    h = jnp.maximum(x @ w1.T + b1, 0.0)
    return h @ w2.T + b2


if __name__ == "__main__":
    key = jax.random.PRNGKey(0)
    kx, kp = jax.random.split(key)
    w1, b1, w2, b2 = init_params(kp)

    # Small batch (single tile) and a batch that is not a multiple of the tile
    # (exercises the padded-tail path and a multi-step grid).
    for B, tb in ((8, 128), (300, 128)):
        x = jax.random.normal(jax.random.fold_in(kx, B), (B, 3), jnp.float32)
        out = jax.block_until_ready(weathernet_forward(x, w1, b1, w2, b2, tb=tb))
        ref = reference_forward(x, w1, b1, w2, b2)
        assert out.shape == (B, 4)
        assert jnp.allclose(out, ref, atol=1e-5, rtol=1e-5), float(
            jnp.max(jnp.abs(out - ref)))

    print("KERNEL_OK")
</pallas_src>

<mosaic_0001>
module attributes {stable_mosaic.version = 11 : i64} {
  func.func @weathernet_kernel(%arg0: i32, %arg1: memref<3x128xf32, #tpu.memory_space<vmem>>, %arg2: memref<16x3xf32, #tpu.memory_space<vmem>>, %arg3: memref<16x1xf32, #tpu.memory_space<vmem>>, %arg4: memref<4x16xf32, #tpu.memory_space<vmem>>, %arg5: memref<4x1xf32, #tpu.memory_space<vmem>>, %arg6: memref<4x128xf32, #tpu.memory_space<vmem>>) attributes {dimension_semantics = [#tpu.dimension_semantics<parallel>], iteration_bounds = array<i64: 1>, scalar_prefetch = 0 : i64, scratch_operands = 0 : i64, tpu.core_type = #tpu.core_type<tc>, window_params = [{transform_indices = @transform_0, window_bounds = array<i64: 3, 128>}, {pipeline_mode = #tpu.pipeline_mode<synchronous>, transform_indices = @transform_1, window_bounds = array<i64: 16, 3>}, {pipeline_mode = #tpu.pipeline_mode<synchronous>, transform_indices = @transform_2, window_bounds = array<i64: 16, 1>}, {pipeline_mode = #tpu.pipeline_mode<synchronous>, transform_indices = @transform_3, window_bounds = array<i64: 4, 16>}, {pipeline_mode = #tpu.pipeline_mode<synchronous>, transform_indices = @transform_4, window_bounds = array<i64: 4, 1>}, {transform_indices = @transform_5, window_bounds = array<i64: 4, 128>}]} {
    %c0 = arith.constant 0 : index
    %c0_0 = arith.constant 0 : index
    %0 = vector.load %arg1[%c0, %c0_0] : memref<3x128xf32, #tpu.memory_space<vmem>>, vector<3x128xf32>
    %c0_1 = arith.constant 0 : index
    %c0_2 = arith.constant 0 : index
    %1 = vector.load %arg2[%c0_1, %c0_2] : memref<16x3xf32, #tpu.memory_space<vmem>>, vector<16x3xf32>
    %c0_3 = arith.constant 0 : index
    %c0_4 = arith.constant 0 : index
    %2 = vector.load %arg3[%c0_3, %c0_4] : memref<16x1xf32, #tpu.memory_space<vmem>>, vector<16x1xf32>
    %c0_5 = arith.constant 0 : index
    %c0_6 = arith.constant 0 : index
    %3 = vector.load %arg4[%c0_5, %c0_6] : memref<4x16xf32, #tpu.memory_space<vmem>>, vector<4x16xf32>
    %c0_7 = arith.constant 0 : index
    %c0_8 = arith.constant 0 : index
    %4 = vector.load %arg5[%c0_7, %c0_8] : memref<4x1xf32, #tpu.memory_space<vmem>>, vector<4x1xf32>
    %5 = vector.extract_strided_slice %1 {offsets = [0, 0], sizes = [16, 1], strides = [1, 1]} : vector<16x3xf32> to vector<16x1xf32>
    %6 = vector.extract_strided_slice %0 {offsets = [0, 0], sizes = [1, 128], strides = [1, 1]} : vector<3x128xf32> to vector<1x128xf32>
    %7 = vector.broadcast %5 : vector<16x1xf32> to vector<16x128xf32>
    %8 = vector.broadcast %6 : vector<1x128xf32> to vector<16x128xf32>
    %9 = arith.mulf %7, %8 : vector<16x128xf32>
    %10 = vector.broadcast %2 : vector<16x1xf32> to vector<16x128xf32>
    %11 = arith.addf %10, %9 : vector<16x128xf32>
    %12 = vector.extract_strided_slice %1 {offsets = [0, 1], sizes = [16, 1], strides = [1, 1]} : vector<16x3xf32> to vector<16x1xf32>
    %13 = vector.extract_strided_slice %0 {offsets = [1, 0], sizes = [1, 128], strides = [1, 1]} : vector<3x128xf32> to vector<1x128xf32>
    %14 = vector.broadcast %12 : vector<16x1xf32> to vector<16x128xf32>
    %15 = vector.broadcast %13 : vector<1x128xf32> to vector<16x128xf32>
    %16 = arith.mulf %14, %15 : vector<16x128xf32>
    %17 = arith.addf %11, %16 : vector<16x128xf32>
    %18 = vector.extract_strided_slice %1 {offsets = [0, 2], sizes = [16, 1], strides = [1, 1]} : vector<16x3xf32> to vector<16x1xf32>
    %19 = vector.extract_strided_slice %0 {offsets = [2, 0], sizes = [1, 128], strides = [1, 1]} : vector<3x128xf32> to vector<1x128xf32>
    %20 = vector.broadcast %18 : vector<16x1xf32> to vector<16x128xf32>
    %21 = vector.broadcast %19 : vector<1x128xf32> to vector<16x128xf32>
    %22 = arith.mulf %20, %21 : vector<16x128xf32>
    %23 = arith.addf %17, %22 : vector<16x128xf32>
    %cst = arith.constant 0.000000e+00 : f32
    %24 = vector.broadcast %cst : f32 to vector<16x128xf32>
    %25 = arith.maximumf %23, %24 : vector<16x128xf32>
    %26 = vector.extract_strided_slice %3 {offsets = [0, 0], sizes = [4, 1], strides = [1, 1]} : vector<4x16xf32> to vector<4x1xf32>
    %27 = vector.extract_strided_slice %25 {offsets = [0, 0], sizes = [1, 128], strides = [1, 1]} : vector<16x128xf32> to vector<1x128xf32>
    %28 = vector.broadcast %26 : vector<4x1xf32> to vector<4x128xf32>
    %29 = vector.broadcast %27 : vector<1x128xf32> to vector<4x128xf32>
    %30 = arith.mulf %28, %29 : vector<4x128xf32>
    %31 = vector.broadcast %4 : vector<4x1xf32> to vector<4x128xf32>
    %32 = arith.addf %31, %30 : vector<4x128xf32>
    %33 = vector.extract_strided_slice %3 {offsets = [0, 1], sizes = [4, 1], strides = [1, 1]} : vector<4x16xf32> to vector<4x1xf32>
    %34 = vector.extract_strided_slice %25 {offsets = [1, 0], sizes = [1, 128], strides = [1, 1]} : vector<16x128xf32> to vector<1x128xf32>
    %35 = vector.broadcast %33 : vector<4x1xf32> to vector<4x128xf32>
    %36 = vector.broadcast %34 : vector<1x128xf32> to vector<4x128xf32>
    %37 = arith.mulf %35, %36 : vector<4x128xf32>
    %38 = arith.addf %32, %37 : vector<4x128xf32>
    %39 = vector.extract_strided_slice %3 {offsets = [0, 2], sizes = [4, 1], strides = [1, 1]} : vector<4x16xf32> to vector<4x1xf32>
    %40 = vector.extract_strided_slice %25 {offsets = [2, 0], sizes = [1, 128], strides = [1, 1]} : vector<16x128xf32> to vector<1x128xf32>
    %41 = vector.broadcast %39 : vector<4x1xf32> to vector<4x128xf32>
    %42 = vector.broadcast %40 : vector<1x128xf32> to vector<4x128xf32>
    %43 = arith.mulf %41, %42 : vector<4x128xf32>
    %44 = arith.addf %38, %43 : vector<4x128xf32>
    %45 = vector.extract_strided_slice %3 {offsets = [0, 3], sizes = [4, 1], strides = [1, 1]} : vector<4x16xf32> to vector<4x1xf32>
    %46 = vector.extract_strided_slice %25 {offsets = [3, 0], sizes = [1, 128], strides = [1, 1]} : vector<16x128xf32> to vector<1x128xf32>
    %47 = vector.broadcast %45 : vector<4x1xf32> to vector<4x128xf32>
    %48 = vector.broadcast %46 : vector<1x128xf32> to vector<4x128xf32>
    %49 = arith.mulf %47, %48 : vector<4x128xf32>
    %50 = arith.addf %44, %49 : vector<4x128xf32>
    %51 = vector.extract_strided_slice %3 {offsets = [0, 4], sizes = [4, 1], strides = [1, 1]} : vector<4x16xf32> to vector<4x1xf32>
    %52 = vector.extract_strided_slice %25 {offsets = [4, 0], sizes = [1, 128], strides = [1, 1]} : vector<16x128xf32> to vector<1x128xf32>
    %53 = vector.broadcast %51 : vector<4x1xf32> to vector<4x128xf32>
    %54 = vector.broadcast %52 : vector<1x128xf32> to vector<4x128xf32>
    %55 = arith.mulf %53, %54 : vector<4x128xf32>
    %56 = arith.addf %50, %55 : vector<4x128xf32>
    %57 = vector.extract_strided_slice %3 {offsets = [0, 5], sizes = [4, 1], strides = [1, 1]} : vector<4x16xf32> to vector<4x1xf32>
    %58 = vector.extract_strided_slice %25 {offsets = [5, 0], sizes = [1, 128], strides = [1, 1]} : vector<16x128xf32> to vector<1x128xf32>
    %59 = vector.broadcast %57 : vector<4x1xf32> to vector<4x128xf32>
    %60 = vector.broadcast %58 : vector<1x128xf32> to vector<4x128xf32>
    %61 = arith.mulf %59, %60 : vector<4x128xf32>
    %62 = arith.addf %56, %61 : vector<4x128xf32>
    %63 = vector.extract_strided_slice %3 {offsets = [0, 6], sizes = [4, 1], strides = [1, 1]} : vector<4x16xf32> to vector<4x1xf32>
    %64 = vector.extract_strided_slice %25 {offsets = [6, 0], sizes = [1, 128], strides = [1, 1]} : vector<16x128xf32> to vector<1x128xf32>
    %65 = vector.broadcast %63 : vector<4x1xf32> to vector<4x128xf32>
    %66 = vector.broadcast %64 : vector<1x128xf32> to vector<4x128xf32>
    %67 = arith.mulf %65, %66 : vector<4x128xf32>
    %68 = arith.addf %62, %67 : vector<4x128xf32>
    %69 = vector.extract_strided_slice %3 {offsets = [0, 7], sizes = [4, 1], strides = [1, 1]} : vector<4x16xf32> to vector<4x1xf32>
    %70 = vector.extract_strided_slice %25 {offsets = [7, 0], sizes = [1, 128], strides = [1, 1]} : vector<16x128xf32> to vector<1x128xf32>
    %71 = vector.broadcast %69 : vector<4x1xf32> to vector<4x128xf32>
    %72 = vector.broadcast %70 : vector<1x128xf32> to vector<4x128xf32>
    %73 = arith.mulf %71, %72 : vector<4x128xf32>
    %74 = arith.addf %68, %73 : vector<4x128xf32>
    %75 = vector.extract_strided_slice %3 {offsets = [0, 8], sizes = [4, 1], strides = [1, 1]} : vector<4x16xf32> to vector<4x1xf32>
    %76 = vector.extract_strided_slice %25 {offsets = [8, 0], sizes = [1, 128], strides = [1, 1]} : vector<16x128xf32> to vector<1x128xf32>
    %77 = vector.broadcast %75 : vector<4x1xf32> to vector<4x128xf32>
    %78 = vector.broadcast %76 : vector<1x128xf32> to vector<4x128xf32>
    %79 = arith.mulf %77, %78 : vector<4x128xf32>
    %80 = arith.addf %74, %79 : vector<4x128xf32>
    %81 = vector.extract_strided_slice %3 {offsets = [0, 9], sizes = [4, 1], strides = [1, 1]} : vector<4x16xf32> to vector<4x1xf32>
    %82 = vector.extract_strided_slice %25 {offsets = [9, 0], sizes = [1, 128], strides = [1, 1]} : vector<16x128xf32> to vector<1x128xf32>
    %83 = vector.broadcast %81 : vector<4x1xf32> to vector<4x128xf32>
    %84 = vector.broadcast %82 : vector<1x128xf32> to vector<4x128xf32>
    %85 = arith.mulf %83, %84 : vector<4x128xf32>
    %86 = arith.addf %80, %85 : vector<4x128xf32>
    %87 = vector.extract_strided_slice %3 {offsets = [0, 10], sizes = [4, 1], strides = [1, 1]} : vector<4x16xf32> to vector<4x1xf32>
    %88 = vector.extract_strided_slice %25 {offsets = [10, 0], sizes = [1, 128], strides = [1, 1]} : vector<16x128xf32> to vector<1x128xf32>
    %89 = vector.broadcast %87 : vector<4x1xf32> to vector<4x128xf32>
    %90 = vector.broadcast %88 : vector<1x128xf32> to vector<4x128xf32>
    %91 = arith.mulf %89, %90 : vector<4x128xf32>
    %92 = arith.addf %86, %91 : vector<4x128xf32>
    %93 = vector.extract_strided_slice %3 {offsets = [0, 11], sizes = [4, 1], strides = [1, 1]} : vector<4x16xf32> to vector<4x1xf32>
    %94 = vector.extract_strided_slice %25 {offsets = [11, 0], sizes = [1, 128], strides = [1, 1]} : vector<16x128xf32> to vector<1x128xf32>
    %95 = vector.broadcast %93 : vector<4x1xf32> to vector<4x128xf32>
    %96 = vector.broadcast %94 : vector<1x128xf32> to vector<4x128xf32>
    %97 = arith.mulf %95, %96 : vector<4x128xf32>
    %98 = arith.addf %92, %97 : vector<4x128xf32>
    %99 = vector.extract_strided_slice %3 {offsets = [0, 12], sizes = [4, 1], strides = [1, 1]} : vector<4x16xf32> to vector<4x1xf32>
    %100 = vector.extract_strided_slice %25 {offsets = [12, 0], sizes = [1, 128], strides = [1, 1]} : vector<16x128xf32> to vector<1x128xf32>
    %101 = vector.broadcast %99 : vector<4x1xf32> to vector<4x128xf32>
    %102 = vector.broadcast %100 : vector<1x128xf32> to vector<4x128xf32>
    %103 = arith.mulf %101, %102 : vector<4x128xf32>
    %104 = arith.addf %98, %103 : vector<4x128xf32>
    %105 = vector.extract_strided_slice %3 {offsets = [0, 13], sizes = [4, 1], strides = [1, 1]} : vector<4x16xf32> to vector<4x1xf32>
    %106 = vector.extract_strided_slice %25 {offsets = [13, 0], sizes = [1, 128], strides = [1, 1]} : vector<16x128xf32> to vector<1x128xf32>
    %107 = vector.broadcast %105 : vector<4x1xf32> to vector<4x128xf32>
    %108 = vector.broadcast %106 : vector<1x128xf32> to vector<4x128xf32>
    %109 = arith.mulf %107, %108 : vector<4x128xf32>
    %110 = arith.addf %104, %109 : vector<4x128xf32>
    %111 = vector.extract_strided_slice %3 {offsets = [0, 14], sizes = [4, 1], strides = [1, 1]} : vector<4x16xf32> to vector<4x1xf32>
    %112 = vector.extract_strided_slice %25 {offsets = [14, 0], sizes = [1, 128], strides = [1, 1]} : vector<16x128xf32> to vector<1x128xf32>
    %113 = vector.broadcast %111 : vector<4x1xf32> to vector<4x128xf32>
    %114 = vector.broadcast %112 : vector<1x128xf32> to vector<4x128xf32>
    %115 = arith.mulf %113, %114 : vector<4x128xf32>
    %116 = arith.addf %110, %115 : vector<4x128xf32>
    %117 = vector.extract_strided_slice %3 {offsets = [0, 15], sizes = [4, 1], strides = [1, 1]} : vector<4x16xf32> to vector<4x1xf32>
    %118 = vector.extract_strided_slice %25 {offsets = [15, 0], sizes = [1, 128], strides = [1, 1]} : vector<16x128xf32> to vector<1x128xf32>
    %119 = vector.broadcast %117 : vector<4x1xf32> to vector<4x128xf32>
    %120 = vector.broadcast %118 : vector<1x128xf32> to vector<4x128xf32>
    %121 = arith.mulf %119, %120 : vector<4x128xf32>
    %122 = arith.addf %116, %121 : vector<4x128xf32>
    %c0_9 = arith.constant 0 : index
    %c0_10 = arith.constant 0 : index
    %123 = vector.load %arg6[%c0_9, %c0_10] : memref<4x128xf32, #tpu.memory_space<vmem>>, vector<4x128xf32>
    tpu.vector_store %arg6[%c0_9, %c0_10], %122 {strides = array<i32>} : memref<4x128xf32, #tpu.memory_space<vmem>>, vector<4x128xf32>,
    return
  }
  func.func @transform_0(%arg0: i32) -> (i32, i32) {
    %c0_i32 = arith.constant 0 : i32
    %c0_i32_0 = arith.constant 0 : i32
    return %c0_i32, %arg0 : i32, i32
  }
  func.func @transform_1(%arg0: i32) -> (i32, i32) {
    %c0_i32 = arith.constant 0 : i32
    %c0_i32_0 = arith.constant 0 : i32
    %c0_i32_1 = arith.constant 0 : i32
    return %c0_i32, %c0_i32_0 : i32, i32
  }
  func.func @transform_2(%arg0: i32) -> (i32, i32) {
    %c0_i32 = arith.constant 0 : i32
    %c0_i32_0 = arith.constant 0 : i32
    %c0_i32_1 = arith.constant 0 : i32
    return %c0_i32, %c0_i32_0 : i32, i32
  }
  func.func @transform_3(%arg0: i32) -> (i32, i32) {
    %c0_i32 = arith.constant 0 : i32
    %c0_i32_0 = arith.constant 0 : i32
    %c0_i32_1 = arith.constant 0 : i32
    return %c0_i32, %c0_i32_0 : i32, i32
  }
  func.func @transform_4(%arg0: i32) -> (i32, i32) {
    %c0_i32 = arith.constant 0 : i32
    %c0_i32_0 = arith.constant 0 : i32
    %c0_i32_1 = arith.constant 0 : i32
    return %c0_i32, %c0_i32_0 : i32, i32
  }
  func.func @transform_5(%arg0: i32) -> (i32, i32) {
    %c0_i32 = arith.constant 0 : i32
    %c0_i32_0 = arith.constant 0 : i32
    return %c0_i32, %arg0 : i32, i32
  }
}

</mosaic_0001>

<bundles_post_ra>
// kernel: weathernet_forward.1
= control target key start
LH: loop header
LB: loop body
LE: loop exit
PB: predicated region body
PF: predicated region fallthrough
CT: control target
= control target key end

     0   :  { %10 = vsyncpa [#allocation3], 0  ;;  %s679_s0 = inlined_call_operand.hbm [shape: f32[3,128], index: 0, kind: input, shape index: {}]   ;;  %s680_s1 = inlined_call_operand.hbm [shape: f32[16,3], index: 1, kind: input, shape index: {}]   ;;  %s681_s2 = inlined_call_operand.hbm [shape: f32[16,1], index: 2, kind: input, shape index: {}]   ;;  %s682_s3 = inlined_call_operand.hbm [shape: f32[4,16], index: 3, kind: input, shape index: {}]   ;;  %s683_s4 = inlined_call_operand.hbm [shape: f32[4,1], index: 4, kind: input, shape index: {}]   ;;  %s684_s5 = inlined_call_operand.hbm [shape: f32[4,128], index: 5, kind: output, shape index: {}]  }
   0x1   :  { %11 = vsyncpa [#allocation6], 0 }
   0x2   :  { %12 = vsyncpa [#allocation9], 0 }
   0x3   :  { %13 = vsyncpa [#allocation4], 0  ;;  %s522_s18 = smov [#allocation5]   ;;  %s382_s22 = scalar_lea.hbm %s680_s1, 256 }
   0x4   :  { %s29_s19 = sshll.u32 %s522_s18, 4  ;;  %p383_p0 = scmp.ne.s32.totalorder %s680_s1, %s382_s22  ;;  %s30_s19 = int_to_ptr.vmem [resolvable:$true] %s29_s19 }
   0x5   :  { %p386_p1 = scmp.lt.u32.totalorder %s382_s22, %s680_s1 }
   0x7   :  { %p388_p2 = pnand %p386_p1, %p383_p0 }
   0x9   :  { %391 = shalt.err (!%p388_p2)
}
   0xa   :  { %s392_s27 = scalar_lea.vmem %s30_s19, 256  ;;  %p397_p4 = scmp.lt.s32.totalorder %s30_s19, %s30_s19 }
   0xb   :  { %p393_p3 = scmp.ne.s32.totalorder %s30_s19, %s392_s27  ;;  %p398_p5 = scmp.lt.s32.totalorder %s392_s27, %s392_s27 }
   0xd   :  { %p399_p6 = por %p398_p5, %p397_p4 }
   0xf   :  { %p400_p7 = pnand %p399_p6, %p393_p3 }
  0x11   :  { %403 = shalt.err (!%p400_p7)
}
  0x12   :  { %s523_s28 = smov 128   ;;  %s524_s29 = smov 8  }
  0x13   :  { %35 = dma.hbm_to_vmem [thread:$0]  %s680_s1, 256, %s30_s19, [#allocation6], %s523_s28, %s523_s28, %s524_s29  }
  0x14   :  { %s525_s7 = smov [#allocation8]   ;;  %s526_s9 = smov [#allocation2]  }
  0x15   :  { %s54_s8 = sshll.u32 %s525_s7, 4  ;;  %s20_s10 = sshll.u32 %s526_s9, 4  ;;  %s55_s8 = int_to_ptr.vmem [resolvable:$true] %s54_s8  ;;  %s21_s10 = int_to_ptr.vmem [resolvable:$true] %s20_s10 }
  0x16   :  { %s404_s13 = scalar_lea.hbm %s682_s3, 64 }
  0x17   :  { %p405_p8 = scmp.ne.s32.totalorder %s682_s3, %s404_s13  ;;  %p408_p9 = scmp.lt.u32.totalorder %s404_s13, %s682_s3 }
  0x19   :  { %p410_p10 = pnand %p408_p9, %p405_p8 }
  0x1b   :  { %413 = shalt.err (!%p410_p10)
}
  0x1c   :  { %s414_s1 = scalar_lea.vmem %s55_s8, 64  ;;  %p419_p12 = scmp.lt.s32.totalorder %s55_s8, %s55_s8 }
  0x1d   :  { %p415_p11 = scmp.ne.s32.totalorder %s55_s8, %s414_s1  ;;  %p420_p13 = scmp.lt.s32.totalorder %s414_s1, %s414_s1 }
  0x1f   :  { %p421_p0 = por %p420_p13, %p419_p12 }
  0x21   :  { %p422_p1 = pnand %p421_p0, %p415_p11 }
  0x23   :  { %425 = shalt.err (!%p422_p1)
}
  0x24   :  { %57 = dma.hbm_to_vmem [thread:$0]  %s682_s3, 64, %s55_s8, [#allocation9]  }
  0x25   :  { %s426_s22 = scalar_lea.hbm %s679_s0, 64 }
  0x26   :  { %p427_p2 = scmp.ne.s32.totalorder %s679_s0, %s426_s22  ;;  %p430_p3 = scmp.lt.u32.totalorder %s426_s22, %s679_s0 }
  0x28   :  { %p432_p4 = pnand %p430_p3, %p427_p2 }
  0x2a   :  { %435 = shalt.err (!%p432_p4)
}
  0x2b   :  { %s436_s27 = scalar_lea.vmem %s21_s10, 64  ;;  %p441_p6 = scmp.lt.s32.totalorder %s21_s10, %s21_s10 }
  0x2c   :  { %p437_p5 = scmp.ne.s32.totalorder %s21_s10, %s436_s27  ;;  %p442_p7 = scmp.lt.s32.totalorder %s436_s27, %s436_s27 }
  0x2e   :  { %p443_p8 = por %p442_p7, %p441_p6 }
  0x30   :  { %p444_p9 = pnand %p443_p8, %p437_p5 }
  0x32   :  { %447 = shalt.err (!%p444_p9)
}
  0x33   :  { %23 = dma.hbm_to_vmem [thread:$0]  %s679_s0, 64, %s21_s10, [#allocation3]  }
  0x34   :  { %s527_s6 = smov [#allocation7]   ;;  %s528_s8 = smov [#allocation10]  }
  0x35   :  { %s41_s7 = sshll.u32 %s527_s6, 4  ;;  %s64_s9 = sshll.u32 %s528_s8, 4  ;;  %s42_s7 = int_to_ptr.vmem [resolvable:$true] %s41_s7  ;;  %s65_s9 = int_to_ptr.vmem [resolvable:$true] %s64_s9 }
  0x36   :  { %s448_s13 = scalar_lea.hbm %s681_s2, 256 }
  0x37   :  { %p449_p10 = scmp.ne.s32.totalorder %s681_s2, %s448_s13  ;;  %p452_p11 = scmp.lt.u32.totalorder %s448_s13, %s681_s2 }
  0x39   :  { %p454_p12 = pnand %p452_p11, %p449_p10 }
  0x3b   :  { %457 = shalt.err (!%p454_p12)
}
  0x3c   :  { %s458_s0 = scalar_lea.vmem %s42_s7, 256  ;;  %p463_p0 = scmp.lt.s32.totalorder %s42_s7, %s42_s7 }
  0x3d   :  { %p459_p13 = scmp.ne.s32.totalorder %s42_s7, %s458_s0  ;;  %p464_p1 = scmp.lt.s32.totalorder %s458_s0, %s458_s0 }
  0x3f   :  { %p465_p2 = por %p464_p1, %p463_p0 }
  0x41   :  { %p466_p3 = pnand %p465_p2, %p459_p13 }
  0x43   :  { %469 = shalt.err (!%p466_p3)
}
  0x44   :  { %47 = dma.hbm_to_vmem [thread:$0]  %s681_s2, 256, %s42_s7, [#allocation6], %s523_s28, %s523_s28, %s524_s29  }
  0x45   :  { %s470_s20 = scalar_lea.hbm %s683_s4, 64 }
  0x46   :  { %p471_p4 = scmp.ne.s32.totalorder %s683_s4, %s470_s20  ;;  %p474_p5 = scmp.lt.u32.totalorder %s470_s20, %s683_s4 }
  0x48   :  { %p476_p6 = pnand %p474_p5, %p471_p4 }
  0x4a   :  { %479 = shalt.err (!%p476_p6)
}
  0x4b   :  { %s480_s25 = scalar_lea.vmem %s65_s9, 64  ;;  %p485_p8 = scmp.lt.s32.totalorder %s65_s9, %s65_s9 }
  0x4c   :  { %p481_p7 = scmp.ne.s32.totalorder %s65_s9, %s480_s25  ;;  %p486_p9 = scmp.lt.s32.totalorder %s480_s25, %s480_s25 }
  0x4e   :  { %p487_p10 = por %p486_p9, %p485_p8 }
  0x50   :  { %p488_p11 = pnand %p487_p10, %p481_p7 }
  0x52   :  { %491 = shalt.err (!%p488_p11)
}
  0x53   :  { %67 = dma.hbm_to_vmem [thread:$0]  %s683_s4, 64, %s65_s9, [#allocation9]  }
  0x54   :  { %514 = dma.done.wait [#allocation3], 64  }
  0x55   :  { %515 = vsyncadd [#allocation3], 4294967232 }
  0x56   :  { %516 = dma.done.wait [#allocation6], 512  }
  0x57   :  { %517 = vsyncadd [#allocation6], 4294966784 }
  0x58   :  { %518 = dma.done.wait [#allocation9], 128  }
  0x59   :  { %519 = vsyncadd [#allocation9], 4294967168  ;;  %v529_v0 = vmov 1   ;;  %v530_v1 = vmov 0   ;;  %v84_v2 = vld [vmem:[#allocation5] sm:$0xff]  ;;  %v531_v4 = vmov 2   ;;  %v100_v22 = vlaneseq }
  0x5a   :  { %361 = vset.pattern.permute.xlu1 %v529_v0  ;;  %360 = vset.pattern.permute.xlu0 %v530_v1  ;;  %v88_v3 = vld [vmem:[#allocation8] sm:$0xf]  ;;  %v89_v5 = vld [vmem:[#allocation10] sm:$0xf]  ;;  %v86_v6 = vld [vmem:[#allocation7] sm:$0xff]  ;;  %v532_v9 = vmov 6  }
  0x5b   :  { %119 = vperm.xlu1 %361, %v84_v2   ;;  %92 = vperm.xlu0 %360, %v84_v2   ;;  %v85_v7 = vld [vmem:[#allocation5 + $0x8] sm:$0xff]  ;;  %v87_v8 = vld [vmem:[#allocation7 + $0x8] sm:$0xff]  ;;  %v533_v10 = vmov 3   ;;  %v534_v11 = vmov 9   ;;  %v535_v12 = vmov 4   ;;  %v536_v13 = vmov 12  }
  0x5c   :  { %v537_v14 = vmov 5   ;;  %v538_v15 = vmov 15   ;;  %v539_v16 = vmov 7   ;;  %v540_v17 = vmov 8   ;;  %v83_v27 = vld [vmem:[#allocation2] sm:$0x7] }
  0x5d   :  { %v541_v18 = vmov 10   ;;  %v542_v19 = vmov 11   ;;  %v543_v20 = vmov 13   ;;  %v544_v21 = vmov 14   ;;  %s545_s4 = smov [#allocation11]  }
  0x5e   :  { %v642_v23 = vshrl.u32 %v100_v22, 7  ;;  %s325_s29 = sshll.u32 %s545_s4, 4  ;;  %s326_s29 = int_to_ptr.vmem [resolvable:$true] %s325_s29 }
  0x5f   :  { %362 = vset.pattern.permute.xlu1 %v531_v4  ;;  %364 = vset.pattern.permute.xlu0 %v529_v0  ;;  %s492_s26 = scalar_lea.vmem %s326_s29, 64  ;;  %p497_p13 = scmp.lt.s32.totalorder %s326_s29, %s326_s29 }
  0x60   :  { %135 = vperm.xlu1 %362, %v84_v2   ;;  %169 = vperm.xlu0 %364, %v88_v3   ;;  %v645_v24 = vsub.s32 0, %v642_v23  ;;  %v648_v28 = vsub.s32 1, %v642_v23  ;;  %v652_v30 = vsub.s32 2, %v642_v23  ;;  %v194_v52 = vsub.s32 3, %v642_v23  ;;  %p493_p12 = scmp.ne.s32.totalorder %s326_s29, %s492_s26  ;;  %p498_p0 = scmp.lt.s32.totalorder %s492_s26, %s492_s26 }
  0x61   :  { %v204_v56 = vsub.s32 4, %v642_v23  ;;  %v214_v62 = vsub.s32 5, %v642_v23 }
  0x62   :  { %v103_v29 = vrot.slane %v83_v27, %v645_v24  ;;  %v129_v33 = vrot.slane %v83_v27, %v648_v28  ;;  %v145_v35 = vrot.slane %v83_v27, %v652_v30  ;;  %p499_p1 = por %p498_p0, %p497_p13 }
  0x64   :  { %363 = vset.pattern.permute.xlu1 %v530_v1  ;;  %365 = vset.pattern.permute.xlu0 %v530_v1  ;;  %p500_p2 = pnand %p499_p1, %p493_p12 }
  0x65   :  { %164 = vperm.xlu1 %363, %v89_v5   ;;  %108 = vperm.xlu0 %365, %v86_v6  }
  0x69   :  { %97 = vperm.xlu1 %363, %v85_v7   ;;  %154 = vperm.xlu0 %365, %v88_v3  }
  0x6d   :  { %366 = vset.pattern.permute.xlu1 %v531_v4  ;;  %113 = vperm.xlu0 %365, %v87_v8  }
  0x6e   :  { %179 = vperm.xlu1 %366, %v88_v3  }
  0x71   :  { %369 = vset.pattern.permute.xlu0 %v531_v4 }
  0x72   :  { %367 = vset.pattern.permute.xlu1 %v529_v0  ;;  %139 = vperm.xlu0 %369, %v85_v7  }
  0x73   :  { %123 = vperm.xlu1 %367, %v85_v7  }
  0x76   :  { %372 = vset.pattern.permute.xlu0 %v532_v9  ;;  %v224_v9 = vsub.s32 6, %v642_v23 }
  0x77   :  { %368 = vset.pattern.permute.xlu1 %v533_v10  ;;  %219 = vperm.xlu0 %372, %v88_v3  }
  0x78   :  { %189 = vperm.xlu1 %368, %v88_v3  }
  0x7b   :  { %375 = vset.pattern.permute.xlu0 %v534_v11 }
  0x7c   :  { %370 = vset.pattern.permute.xlu1 %v535_v12  ;;  %249 = vperm.xlu0 %375, %v88_v3  }
  0x7d   :  { %199 = vperm.xlu1 %370, %v88_v3  }
  0x80   :  { %378 = vset.pattern.permute.xlu0 %v536_v13 }
  0x81   :  { %371 = vset.pattern.permute.xlu1 %v537_v14  ;;  %279 = vperm.xlu0 %378, %v88_v3  }
  0x82   :  { %209 = vperm.xlu1 %371, %v88_v3  }
  0x85   :  { %381 = vset.pattern.permute.xlu0 %v538_v15 }
  0x86   :  { %373 = vset.pattern.permute.xlu1 %v539_v16  ;;  %309 = vperm.xlu0 %381, %v88_v3   ;;  %v234_v16 = vsub.s32 7, %v642_v23 }
  0x87   :  { %229 = vperm.xlu1 %373, %v88_v3  }
  0x8b   :  { %374 = vset.pattern.permute.xlu1 %v540_v17 }
  0x8c   :  { %239 = vperm.xlu1 %374, %v88_v3  }
  0x90   :  { %376 = vset.pattern.permute.xlu1 %v541_v18 }
  0x91   :  { %259 = vperm.xlu1 %376, %v88_v3  }
  0x95   :  { %377 = vset.pattern.permute.xlu1 %v542_v19 }
  0x96   :  { %269 = vperm.xlu1 %377, %v88_v3  }
  0x9a   :  { %379 = vset.pattern.permute.xlu1 %v543_v20 }
  0x9b   :  { %289 = vperm.xlu1 %379, %v88_v3  }
  0x9f   :  { %380 = vset.pattern.permute.xlu1 %v544_v21 }
  0xa0   :  { %299 = vperm.xlu1 %380, %v88_v3  }
  0xda   :  { %v120_v25 = vpop.permute.xlu1 %119  ;;  %v93_v26 = vpop.permute.xlu0 %92 }
  0xdb   :  { %v104_v34 = vmul.f32 %v103_v29, %v93_v26  ;;  %v130_v38 = vmul.f32 %v129_v33, %v120_v25 }
  0xdf   :  { %v136_v31 = vpop.permute.xlu1 %135  ;;  %v170_v32 = vpop.permute.xlu0 %169 }
  0xe0   :  { %v146_v40 = vmul.f32 %v145_v35, %v136_v31 }
  0xe4   :  { %v165_v36 = vpop.permute.xlu1 %164  ;;  %v109_v37 = vpop.permute.xlu0 %108 }
  0xe5   :  { %v116_v39 = vadd.f32 %v109_v37, %v104_v34 }
  0xe7   :  { %v132_v41 = vadd.f32 %v130_v38, %v116_v39 }
  0xe8   :  { %v98_v42 = vpop.permute.xlu1 %97  ;;  %v155_v47 = vpop.permute.xlu0 %154 }
  0xe9   :  { %v148_v43 = vadd.f32 %v146_v40, %v132_v41  ;;  %v105_v58 = vmul.f32 %v103_v29, %v98_v42 }
  0xeb   :  { %v150_v44 = vmax.f32 %v148_v43, 0.0 }
  0xec   :  { %v114_v57 = vpop.permute.xlu0 %113 }
  0xed   :  { %v180_v45 = vpop.permute.xlu1 %179  ;;  %v160_v46 = vrot.slane %v150_v44, %v645_v24  ;;  %v175_v50 = vrot.slane %v150_v44, %v648_v28  ;;  %v185_v55 = vrot.slane %v150_v44, %v652_v30  ;;  %v195_v61 = vrot.slane %v150_v44, %v194_v52 }
  0xee   :  { %v117_v63 = vadd.f32 %v114_v57, %v105_v58  ;;  %v205_v3 = vrot.slane %v150_v44, %v204_v56  ;;  %v215_v11 = vrot.slane %v150_v44, %v214_v62  ;;  %v225_v18 = vrot.slane %v150_v44, %v224_v9 }
  0xef   :  { %v161_v48 = vmul.f32 %v160_v46, %v155_v47  ;;  %v176_v54 = vmul.f32 %v175_v50, %v170_v32  ;;  %v186_v0 = vmul.f32 %v185_v55, %v180_v45  ;;  %v235_v25 = vrot.slane %v150_v44, %v234_v16 }
  0xf1   :  { %v167_v51 = vadd.f32 %v165_v36, %v161_v48  ;;  %v140_v4 = vpop.permute.xlu0 %139 }
  0xf2   :  { %v124_v49 = vpop.permute.xlu1 %123  ;;  %v147_v7 = vmul.f32 %v145_v35, %v140_v4 }
  0xf3   :  { %v177_v59 = vadd.f32 %v176_v54, %v167_v51  ;;  %v131_v60 = vmul.f32 %v129_v33, %v124_v49 }
  0xf5   :  { %v187_v5 = vadd.f32 %v186_v0, %v177_v59  ;;  %v133_v6 = vadd.f32 %v131_v60, %v117_v63 }
  0xf6   :  { %v220_v17 = vpop.permute.xlu0 %219 }
  0xf7   :  { %v190_v53 = vpop.permute.xlu1 %189  ;;  %v149_v13 = vadd.f32 %v147_v7, %v133_v6  ;;  %v226_v21 = vmul.f32 %v225_v18, %v220_v17 }
  0xf8   :  { %v196_v1 = vmul.f32 %v195_v61, %v190_v53 }
  0xf9   :  { %v151_v20 = vmax.f32 %v149_v13, 0.0 }
  0xfa   :  { %v197_v10 = vadd.f32 %v196_v1, %v187_v5 }
  0xfb   :  { %v245_v29 = vrot.slane %v151_v20, %v645_v24  ;;  %v255_v32 = vrot.slane %v151_v20, %v648_v28  ;;  %v250_v35 = vpop.permute.xlu0 %249  ;;  %v265_v38 = vrot.slane %v151_v20, %v652_v30  ;;  %v275_v41 = vrot.slane %v151_v20, %v194_v52 }
  0xfc   :  { %v200_v2 = vpop.permute.xlu1 %199  ;;  %v285_v46 = vrot.slane %v151_v20, %v204_v56  ;;  %v295_v28 = vrot.slane %v151_v20, %v214_v62  ;;  %v305_v51 = vrot.slane %v151_v20, %v224_v9  ;;  %v315_v55 = vrot.slane %v151_v20, %v234_v16 }
  0xfd   :  { %v206_v8 = vmul.f32 %v205_v3, %v200_v2  ;;  %v256_v37 = vmul.f32 %v255_v32, %v250_v35 }
  0xff   :  { %v207_v14 = vadd.f32 %v206_v8, %v197_v10 }
 0x100   :  { %v280_v45 = vpop.permute.xlu0 %279 }
 0x101   :  { %v210_v12 = vpop.permute.xlu1 %209  ;;  %v286_v47 = vmul.f32 %v285_v46, %v280_v45 }
 0x102   :  { %v216_v15 = vmul.f32 %v215_v11, %v210_v12 }
 0x104   :  { %v217_v19 = vadd.f32 %v216_v15, %v207_v14 }
 0x105   :  { %v310_v53 = vpop.permute.xlu0 %309 }
 0x106   :  { %v230_v22 = vpop.permute.xlu1 %229  ;;  %v227_v26 = vadd.f32 %v226_v21, %v217_v19  ;;  %v316_v52 = vmul.f32 %v315_v55, %v310_v53 }
 0x107   :  { %v236_v27 = vmul.f32 %v235_v25, %v230_v22 }
 0x109   :  { %v237_v33 = vadd.f32 %v236_v27, %v227_v26 }
 0x10b   :  { %v240_v31 = vpop.permute.xlu1 %239 }
 0x10c   :  { %v246_v34 = vmul.f32 %v245_v29, %v240_v31 }
 0x10e   :  { %v247_v36 = vadd.f32 %v246_v34, %v237_v33 }
 0x110   :  { %v260_v23 = vpop.permute.xlu1 %259  ;;  %v257_v39 = vadd.f32 %v256_v37, %v247_v36 }
 0x111   :  { %v266_v40 = vmul.f32 %v265_v38, %v260_v23 }
 0x113   :  { %v267_v43 = vadd.f32 %v266_v40, %v257_v39 }
 0x115   :  { %v270_v42 = vpop.permute.xlu1 %269 }
 0x116   :  { %v276_v44 = vmul.f32 %v275_v41, %v270_v42 }
 0x118   :  { %v277_v24 = vadd.f32 %v276_v44, %v267_v43 }
 0x11a   :  { %v290_v48 = vpop.permute.xlu1 %289  ;;  %v287_v49 = vadd.f32 %v286_v47, %v277_v24 }
 0x11b   :  { %v296_v50 = vmul.f32 %v295_v28, %v290_v48 }
 0x11d   :  { %v297_v57 = vadd.f32 %v296_v50, %v287_v49 }
 0x11f   :  { %v300_v54 = vpop.permute.xlu1 %299 }
 0x120   :  { %v306_v30 = vmul.f32 %v305_v51, %v300_v54 }
 0x122   :  { %v307_v58 = vadd.f32 %v306_v30, %v297_v57 }
 0x124   :  { %v317_v59 = vadd.f32 %v316_v52, %v307_v58 }
 0x126   :  { %318 = vst [vmem:[#allocation11] sm:$0xf] %v317_v59 }
 0x127   :  { %503 = shalt.err (!%p500_p2)
}
 0x128   :  { %s504_s30 = scalar_lea.hbm %s684_s5, 64 }
 0x129   :  { %p505_p3 = scmp.ne.s32.totalorder %s684_s5, %s504_s30  ;;  %p508_p4 = scmp.lt.u32.totalorder %s504_s30, %s684_s5 }
 0x12b   :  { %p510_p5 = pnand %p508_p4, %p505_p3 }
 0x12d   :  { %513 = shalt.err (!%p510_p5)
}
 0x12e   :  { %328 = dma.vmem_to_hbm [thread:$0]  %s326_s29, 64, %s684_s5, [#allocation4]  }
 0x12f   :  { %520 = dma.done.wait [#allocation4], 64  }
 0x130   :  { %521 = vsyncadd [#allocation4], 4294967232 }
 0x131   :  { %332 = vsyncpa [#allocation3], 1 }
 0x132   :  { %333 = vsyncpa [#allocation6], 1 }
 0x133   :  { %334 = vsyncpa [#allocation9], 1 }
 0x134   :  { %335 = vsyncpa [#allocation4], 1 }

</bundles_post_ra>
